<compile_context>
chip_gen: v7x
topology: tpu7x:2x2x1
jax: 0.10.0
libtpu: 0.0.40
codegen_flags: <defaults>
</compile_context>

<pallas_src>
import functools

import jax
import jax.numpy as jnp
from jax.experimental import pallas as pl
from jax.experimental.pallas import tpu as pltpu


def _conv_stats_kernel(x_ref, w_ref, mask_ref, y_ref, mean_ref, m2_ref,
                       *, k, dil, Wp, L, cnt):
    """One image: stride-1 circular conv as k*k shifted dots + centered BN partials.

    x_ref   : (C_in, P)          bf16   padded plane, pixels on lanes (+tap guard pad)
    w_ref   : (k*k, C_out, C_in) bf16   per-tap weights (constant block, DMA'd once)
    mask_ref: (1, L)             f32    1.0 at valid strided output positions
    y_ref   : (C_out, L)                stride-1 conv slab for this image
    mean_ref/m2_ref : (C_out, 1) f32    per-image mean / centered sum of squares
    """
    acc = jnp.zeros(y_ref.shape, jnp.float32)
    for kh in range(k):
        for kw in range(k):
            t = kh * k + kw
            delta = (kh * Wp + kw) * dil              # constant flat shift for this tap
            acc = acc + jnp.dot(w_ref[t], x_ref[:, delta:delta + L],
                                preferred_element_type=jnp.float32)   # MXU, f32 accumulate
    y_ref[...] = acc.astype(y_ref.dtype)

    mask = mask_ref[...]                              # (1, L) broadcast over channels
    mu = jnp.sum(acc * mask, axis=1, keepdims=True) * (1.0 / cnt)
    cen = (acc - mu) * mask
    mean_ref[...] = mu
    m2_ref[...] = jnp.sum(cen * cen, axis=1, keepdims=True)


def _relu_ccl_conv_bn(x, w, gamma, beta, *, stride=1, dilation=1, eps=1e-5,
                      compute_dtype=jnp.bfloat16):
    """x: (N, C_in, H, W) f32.  w: (C_out, C_in, k, k) PyTorch conv weight (bias=False)."""
    N, C_in, H, W_sp = x.shape
    C_out, C_in_w, k, k2 = w.shape
    assert C_in_w == C_in and k == k2

    # Circular padding amount (torch >= 1.5 path of the reference module).
    # NOTE: relies on pp <= H, W (torch's circular pad limit); jnp 'wrap' matches there.
    pp = ((k - 1) * dilation + 1 - stride) // 2
    xr = jnp.maximum(x, 0.0)                          # ReLU once (commutes with the pad/gather)
    xp = jnp.pad(xr, ((0, 0), (0, 0), (pp, pp), (pp, pp)), mode="wrap")
    Hp, Wp = H + 2 * pp, W_sp + 2 * pp

    span = dilation * (k - 1)
    Ho = (Hp - span - 1) // stride + 1                # true conv output size
    Wo = (Wp - span - 1) // stride + 1
    Ho1 = Hp - span                                   # stride-1 rows computed in-kernel
    L = Ho1 * Wp                                      # flattened stride-1 columns / image
    P = Hp * Wp + span                                # padded plane + tap over-read guard
    kk = k * k
    cnt = Ho * Wo                                     # true pixels per image for BN stats

    # Flattened per-image planes, bf16 (halves the dominant HBM read).
    x_flat = xp.reshape(N, C_in, Hp * Wp).astype(compute_dtype)
    x_flat = jnp.pad(x_flat, ((0, 0), (0, 0), (0, span)))
    # Per-tap weights (k*k, C_out, C_in).
    w_taps = jnp.transpose(w, (2, 3, 0, 1)).reshape(kk, C_out, C_in).astype(compute_dtype)
    # Statistics mask: 1.0 exactly at positions (ho*stride, wo*stride) of the stride-1 slab.
    mask2d = jnp.zeros((Ho1, Wp), jnp.float32)
    mask2d = mask2d.at[: (Ho - 1) * stride + 1: stride,
                       : (Wo - 1) * stride + 1: stride].set(1.0)
    mask = mask2d.reshape(1, L)

    kern = functools.partial(_conv_stats_kernel, k=k, dil=dilation, Wp=Wp, L=L,
                             cnt=float(cnt))

    # VMEM budget: double-buffered input + output blocks, f32 accumulator, small constants.
    itm = jnp.dtype(compute_dtype).itemsize
    est = 2 * (C_in * P + C_out * L) * itm + C_out * L * 4 + kk * C_out * C_in * itm + L * 4
    cp_kwargs = dict(dimension_semantics=("parallel",))
    if est > 30 * (1 << 20):
        # TODO(synk): for planes too large for VMEM (v7x has 64 MiB), tile over output-row
        # bands with a halo DMA instead of one whole plane per grid step.
        cp_kwargs["vmem_limit_bytes"] = min(2 * est, 100 * (1 << 20))

    y, mean_n, m2_n = pl.pallas_call(
        kern,
        out_shape=(
            jax.ShapeDtypeStruct((N, C_out, L), compute_dtype),
            jax.ShapeDtypeStruct((N, C_out, 1), jnp.float32),
            jax.ShapeDtypeStruct((N, C_out, 1), jnp.float32),
        ),
        grid=(N,),
        in_specs=[
            pl.BlockSpec((None, C_in, P), lambda n: (n, 0, 0)),     # one padded plane / step
            pl.BlockSpec((kk, C_out, C_in), lambda n: (0, 0, 0)),   # weights: constant block
            pl.BlockSpec((1, L), lambda n: (0, 0)),                 # stats mask: constant
        ],
        out_specs=(
            pl.BlockSpec((None, C_out, L), lambda n: (n, 0, 0)),
            pl.BlockSpec((None, C_out, 1), lambda n: (n, 0, 0)),
            pl.BlockSpec((None, C_out, 1), lambda n: (n, 0, 0)),
        ),
        compiler_params=pltpu.CompilerParams(**cp_kwargs),
    )(x_flat, w_taps, mask)

    # Strided / valid-column subsample of the stride-1 slab.  XLA fuses this gather with the
    # BN affine and the f32 cast below into a single copy (one read of the slab, one write).
    y = y.reshape(N, C_out, Ho1, Wp)[:, :, : (Ho - 1) * stride + 1: stride,
                                     : (Wo - 1) * stride + 1: stride]
    y = y.astype(jnp.float32)                                       # (N, C_out, Ho, Wo)

    if Ho == 1:
        # AdaptiveBatchNorm2d: identity when the conv output height == 1 (static decision).
        return y

    # Combine equal-count per-image centered statistics -> batch mean / biased variance.
    mean = jnp.mean(mean_n, axis=0)                                  # (C_out, 1)
    var = (jnp.sum(m2_n, axis=0)
           + cnt * jnp.sum((mean_n - mean[None]) ** 2, axis=0)) / (N * cnt)
    inv = jax.lax.rsqrt(var + eps)
    g = gamma.astype(jnp.float32).reshape(C_out, 1)
    b = beta.astype(jnp.float32).reshape(C_out, 1)
    scale = (g * inv).reshape(1, C_out, 1, 1)
    shift = (b - mean * g * inv).reshape(1, C_out, 1, 1)
    return y * scale + shift


relu_ccl_conv_bn = jax.jit(
    _relu_ccl_conv_bn,
    static_argnames=("stride", "dilation", "eps", "compute_dtype"))


def _reference(x, w, gamma, beta, *, stride=1, dilation=1, eps=1e-5):
    """Pure-JAX f32 mirror of the PyTorch forward (circular conv + training-mode BN)."""
    k = w.shape[-1]
    pp = ((k - 1) * dilation + 1 - stride) // 2
    y = jnp.maximum(x, 0.0)
    yp = jnp.pad(y, ((0, 0), (0, 0), (pp, pp), (pp, pp)), mode="wrap")
    o = jax.lax.conv_general_dilated(
        yp, w, window_strides=(stride, stride), padding="VALID",
        rhs_dilation=(dilation, dilation),
        dimension_numbers=("NCHW", "OIHW", "NCHW"))
    if o.shape[-2] == 1:
        return o
    mean = jnp.mean(o, axis=(0, 2, 3), keepdims=True)
    var = jnp.mean((o - mean) ** 2, axis=(0, 2, 3), keepdims=True)
    o = (o - mean) * jax.lax.rsqrt(var + eps)
    return o * gamma.reshape(1, -1, 1, 1) + beta.reshape(1, -1, 1, 1)


if __name__ == "__main__":
    key = jax.random.PRNGKey(0)
    k_x, k_w = jax.random.split(key, 2)

    N, C_in, H, W_sp = 2, 4, 16, 16
    C_out, ksz, s, d = 8, 3, 1, 1          # ReLUcclConvBN(C_in=4, C_out=8, k=3, s=1, d=1)

    x = jax.random.normal(k_x, (N, C_in, H, W_sp), dtype=jnp.float32)
    w = 0.1 * jax.random.normal(k_w, (C_out, C_in, ksz, ksz), dtype=jnp.float32)
    gamma = jnp.ones((C_out,), dtype=jnp.float32)    # BatchNorm affine init (weight=1)
    beta = jnp.zeros((C_out,), dtype=jnp.float32)    # (bias=0)

    out = relu_ccl_conv_bn(x, w, gamma, beta, stride=s, dilation=d)
    out = jax.block_until_ready(out)

    ref = _reference(x, w, gamma, beta, stride=s, dilation=d)
    assert out.shape == ref.shape, (out.shape, ref.shape)
    # bf16 activations/weights on the MXU (f32 accumulation / stats): tolerance sized for
    # ~0.2% bf16 input rounding of the unit-variance normalized output.
    max_err = float(jnp.max(jnp.abs(out - ref)))
    assert jnp.allclose(out, ref, rtol=1e-2, atol=5e-2), max_err

    print("KERNEL_OK")
</pallas_src>

<mosaic_0001>
module attributes {stable_mosaic.version = 11 : i64} {
  func.func @_conv_stats_kernel(%arg0: i32, %arg1: memref<1x4x326xbf16, #tpu.memory_space<vmem>>, %arg2: memref<9x8x4xbf16, #tpu.memory_space<vmem>>, %arg3: memref<1x288xf32, #tpu.memory_space<vmem>>, %arg4: memref<1x8x288xbf16, #tpu.memory_space<vmem>>, %arg5: memref<1x8x1xf32, #tpu.memory_space<vmem>>, %arg6: memref<1x8x1xf32, #tpu.memory_space<vmem>>) attributes {dimension_semantics = [#tpu.dimension_semantics<parallel>], iteration_bounds = array<i64: 2>, scalar_prefetch = 0 : i64, scratch_operands = 0 : i64, tpu.core_type = #tpu.core_type<tc>, window_params = [{transform_indices = @transform_0, window_bounds = array<i64: 1, 4, 326>}, {pipeline_mode = #tpu.pipeline_mode<synchronous>, transform_indices = @transform_1, window_bounds = array<i64: 9, 8, 4>}, {pipeline_mode = #tpu.pipeline_mode<synchronous>, transform_indices = @transform_2, window_bounds = array<i64: 1, 288>}, {transform_indices = @transform_3, window_bounds = array<i64: 1, 8, 288>}, {transform_indices = @transform_4, window_bounds = array<i64: 1, 8, 1>}, {transform_indices = @transform_5, window_bounds = array<i64: 1, 8, 1>}]} {
    %cst = arith.constant 0.000000e+00 : f32
    %0 = vector.broadcast %cst : f32 to vector<8x288xf32>
    %c0 = arith.constant 0 : index
    %c0_0 = arith.constant 0 : index
    %c0_1 = arith.constant 0 : index
    %1 = vector.load %arg2[%c0, %c0_0, %c0_1] : memref<9x8x4xbf16, #tpu.memory_space<vmem>>, vector<1x8x4xbf16>
    %2 = vector.shape_cast %1 : vector<1x8x4xbf16> to vector<8x4xbf16>
    %c0_2 = arith.constant 0 : index
    %c0_3 = arith.constant 0 : index
    %c0_4 = arith.constant 0 : index
    %3 = vector.load %arg1[%c0_2, %c0_3, %c0_4] : memref<1x4x326xbf16, #tpu.memory_space<vmem>>, vector<1x4x288xbf16>
    %4 = vector.shape_cast %3 : vector<1x4x288xbf16> to vector<4x288xbf16>
    %cst_5 = arith.constant dense<0.000000e+00> : vector<8x288xf32>
    %5 = tpu.matmul %2, %4, %cst_5 {dimension_numbers = #tpu.dot_dimension_numbers<[1], [0], [0], [1], [0, 0, 1, 1], [], []>} : vector<8x4xbf16>, vector<4x288xbf16>, vector<8x288xf32> -> vector<8x288xf32>
    %6 = arith.addf %0, %5 : vector<8x288xf32>
    %c1 = arith.constant 1 : index
    %c0_6 = arith.constant 0 : index
    %c0_7 = arith.constant 0 : index
    %7 = vector.load %arg2[%c1, %c0_6, %c0_7] : memref<9x8x4xbf16, #tpu.memory_space<vmem>>, vector<1x8x4xbf16>
    %8 = vector.shape_cast %7 : vector<1x8x4xbf16> to vector<8x4xbf16>
    %c0_8 = arith.constant 0 : index
    %c0_9 = arith.constant 0 : index
    %c1_10 = arith.constant 1 : index
    %9 = vector.load %arg1[%c0_8, %c0_9, %c1_10] : memref<1x4x326xbf16, #tpu.memory_space<vmem>>, vector<1x4x288xbf16>
    %10 = vector.shape_cast %9 : vector<1x4x288xbf16> to vector<4x288xbf16>
    %cst_11 = arith.constant dense<0.000000e+00> : vector<8x288xf32>
    %11 = tpu.matmul %8, %10, %cst_11 {dimension_numbers = #tpu.dot_dimension_numbers<[1], [0], [0], [1], [0, 0, 1, 1], [], []>} : vector<8x4xbf16>, vector<4x288xbf16>, vector<8x288xf32> -> vector<8x288xf32>
    %12 = arith.addf %6, %11 : vector<8x288xf32>
    %c2 = arith.constant 2 : index
    %c0_12 = arith.constant 0 : index
    %c0_13 = arith.constant 0 : index
    %13 = vector.load %arg2[%c2, %c0_12, %c0_13] : memref<9x8x4xbf16, #tpu.memory_space<vmem>>, vector<1x8x4xbf16>
    %14 = vector.shape_cast %13 : vector<1x8x4xbf16> to vector<8x4xbf16>
    %c0_14 = arith.constant 0 : index
    %c0_15 = arith.constant 0 : index
    %c2_16 = arith.constant 2 : index
    %15 = vector.load %arg1[%c0_14, %c0_15, %c2_16] : memref<1x4x326xbf16, #tpu.memory_space<vmem>>, vector<1x4x288xbf16>
    %16 = vector.shape_cast %15 : vector<1x4x288xbf16> to vector<4x288xbf16>
    %cst_17 = arith.constant dense<0.000000e+00> : vector<8x288xf32>
    %17 = tpu.matmul %14, %16, %cst_17 {dimension_numbers = #tpu.dot_dimension_numbers<[1], [0], [0], [1], [0, 0, 1, 1], [], []>} : vector<8x4xbf16>, vector<4x288xbf16>, vector<8x288xf32> -> vector<8x288xf32>
    %18 = arith.addf %12, %17 : vector<8x288xf32>
    %c3 = arith.constant 3 : index
    %c0_18 = arith.constant 0 : index
    %c0_19 = arith.constant 0 : index
    %19 = vector.load %arg2[%c3, %c0_18, %c0_19] : memref<9x8x4xbf16, #tpu.memory_space<vmem>>, vector<1x8x4xbf16>
    %20 = vector.shape_cast %19 : vector<1x8x4xbf16> to vector<8x4xbf16>
    %c0_20 = arith.constant 0 : index
    %c0_21 = arith.constant 0 : index
    %c18 = arith.constant 18 : index
    %21 = vector.load %arg1[%c0_20, %c0_21, %c18] : memref<1x4x326xbf16, #tpu.memory_space<vmem>>, vector<1x4x288xbf16>
    %22 = vector.shape_cast %21 : vector<1x4x288xbf16> to vector<4x288xbf16>
    %cst_22 = arith.constant dense<0.000000e+00> : vector<8x288xf32>
    %23 = tpu.matmul %20, %22, %cst_22 {dimension_numbers = #tpu.dot_dimension_numbers<[1], [0], [0], [1], [0, 0, 1, 1], [], []>} : vector<8x4xbf16>, vector<4x288xbf16>, vector<8x288xf32> -> vector<8x288xf32>
    %24 = arith.addf %18, %23 : vector<8x288xf32>
    %c4 = arith.constant 4 : index
    %c0_23 = arith.constant 0 : index
    %c0_24 = arith.constant 0 : index
    %25 = vector.load %arg2[%c4, %c0_23, %c0_24] : memref<9x8x4xbf16, #tpu.memory_space<vmem>>, vector<1x8x4xbf16>
    %26 = vector.shape_cast %25 : vector<1x8x4xbf16> to vector<8x4xbf16>
    %c0_25 = arith.constant 0 : index
    %c0_26 = arith.constant 0 : index
    %c19 = arith.constant 19 : index
    %27 = vector.load %arg1[%c0_25, %c0_26, %c19] : memref<1x4x326xbf16, #tpu.memory_space<vmem>>, vector<1x4x288xbf16>
    %28 = vector.shape_cast %27 : vector<1x4x288xbf16> to vector<4x288xbf16>
    %cst_27 = arith.constant dense<0.000000e+00> : vector<8x288xf32>
    %29 = tpu.matmul %26, %28, %cst_27 {dimension_numbers = #tpu.dot_dimension_numbers<[1], [0], [0], [1], [0, 0, 1, 1], [], []>} : vector<8x4xbf16>, vector<4x288xbf16>, vector<8x288xf32> -> vector<8x288xf32>
    %30 = arith.addf %24, %29 : vector<8x288xf32>
    %c5 = arith.constant 5 : index
    %c0_28 = arith.constant 0 : index
    %c0_29 = arith.constant 0 : index
    %31 = vector.load %arg2[%c5, %c0_28, %c0_29] : memref<9x8x4xbf16, #tpu.memory_space<vmem>>, vector<1x8x4xbf16>
    %32 = vector.shape_cast %31 : vector<1x8x4xbf16> to vector<8x4xbf16>
    %c0_30 = arith.constant 0 : index
    %c0_31 = arith.constant 0 : index
    %c20 = arith.constant 20 : index
    %33 = vector.load %arg1[%c0_30, %c0_31, %c20] : memref<1x4x326xbf16, #tpu.memory_space<vmem>>, vector<1x4x288xbf16>
    %34 = vector.shape_cast %33 : vector<1x4x288xbf16> to vector<4x288xbf16>
    %cst_32 = arith.constant dense<0.000000e+00> : vector<8x288xf32>
    %35 = tpu.matmul %32, %34, %cst_32 {dimension_numbers = #tpu.dot_dimension_numbers<[1], [0], [0], [1], [0, 0, 1, 1], [], []>} : vector<8x4xbf16>, vector<4x288xbf16>, vector<8x288xf32> -> vector<8x288xf32>
    %36 = arith.addf %30, %35 : vector<8x288xf32>
    %c6 = arith.constant 6 : index
    %c0_33 = arith.constant 0 : index
    %c0_34 = arith.constant 0 : index
    %37 = vector.load %arg2[%c6, %c0_33, %c0_34] : memref<9x8x4xbf16, #tpu.memory_space<vmem>>, vector<1x8x4xbf16>
    %38 = vector.shape_cast %37 : vector<1x8x4xbf16> to vector<8x4xbf16>
    %c0_35 = arith.constant 0 : index
    %c0_36 = arith.constant 0 : index
    %c36 = arith.constant 36 : index
    %39 = vector.load %arg1[%c0_35, %c0_36, %c36] : memref<1x4x326xbf16, #tpu.memory_space<vmem>>, vector<1x4x288xbf16>
    %40 = vector.shape_cast %39 : vector<1x4x288xbf16> to vector<4x288xbf16>
    %cst_37 = arith.constant dense<0.000000e+00> : vector<8x288xf32>
    %41 = tpu.matmul %38, %40, %cst_37 {dimension_numbers = #tpu.dot_dimension_numbers<[1], [0], [0], [1], [0, 0, 1, 1], [], []>} : vector<8x4xbf16>, vector<4x288xbf16>, vector<8x288xf32> -> vector<8x288xf32>
    %42 = arith.addf %36, %41 : vector<8x288xf32>
    %c7 = arith.constant 7 : index
    %c0_38 = arith.constant 0 : index
    %c0_39 = arith.constant 0 : index
    %43 = vector.load %arg2[%c7, %c0_38, %c0_39] : memref<9x8x4xbf16, #tpu.memory_space<vmem>>, vector<1x8x4xbf16>
    %44 = vector.shape_cast %43 : vector<1x8x4xbf16> to vector<8x4xbf16>
    %c0_40 = arith.constant 0 : index
    %c0_41 = arith.constant 0 : index
    %c37 = arith.constant 37 : index
    %45 = vector.load %arg1[%c0_40, %c0_41, %c37] : memref<1x4x326xbf16, #tpu.memory_space<vmem>>, vector<1x4x288xbf16>
    %46 = vector.shape_cast %45 : vector<1x4x288xbf16> to vector<4x288xbf16>
    %cst_42 = arith.constant dense<0.000000e+00> : vector<8x288xf32>
    %47 = tpu.matmul %44, %46, %cst_42 {dimension_numbers = #tpu.dot_dimension_numbers<[1], [0], [0], [1], [0, 0, 1, 1], [], []>} : vector<8x4xbf16>, vector<4x288xbf16>, vector<8x288xf32> -> vector<8x288xf32>
    %48 = arith.addf %42, %47 : vector<8x288xf32>
    %c8 = arith.constant 8 : index
    %c0_43 = arith.constant 0 : index
    %c0_44 = arith.constant 0 : index
    %49 = vector.load %arg2[%c8, %c0_43, %c0_44] : memref<9x8x4xbf16, #tpu.memory_space<vmem>>, vector<1x8x4xbf16>
    %50 = vector.shape_cast %49 : vector<1x8x4xbf16> to vector<8x4xbf16>
    %c0_45 = arith.constant 0 : index
    %c0_46 = arith.constant 0 : index
    %c38 = arith.constant 38 : index
    %51 = vector.load %arg1[%c0_45, %c0_46, %c38] : memref<1x4x326xbf16, #tpu.memory_space<vmem>>, vector<1x4x288xbf16>
    %52 = vector.shape_cast %51 : vector<1x4x288xbf16> to vector<4x288xbf16>
    %cst_47 = arith.constant dense<0.000000e+00> : vector<8x288xf32>
    %53 = tpu.matmul %50, %52, %cst_47 {dimension_numbers = #tpu.dot_dimension_numbers<[1], [0], [0], [1], [0, 0, 1, 1], [], []>} : vector<8x4xbf16>, vector<4x288xbf16>, vector<8x288xf32> -> vector<8x288xf32>
    %54 = arith.addf %48, %53 : vector<8x288xf32>
    %55 = arith.truncf %54 : vector<8x288xf32> to vector<8x288xbf16>
    %c0_48 = arith.constant 0 : index
    %c0_49 = arith.constant 0 : index
    %c0_50 = arith.constant 0 : index
    %56 = vector.load %arg4[%c0_48, %c0_49, %c0_50] : memref<1x8x288xbf16, #tpu.memory_space<vmem>>, vector<1x8x288xbf16>
    %57 = vector.shape_cast %56 : vector<1x8x288xbf16> to vector<8x288xbf16>
    %58 = vector.shape_cast %55 : vector<8x288xbf16> to vector<1x8x288xbf16>
    tpu.vector_store %arg4[%c0_48, %c0_49, %c0_50], %58 {strides = array<i32>} : memref<1x8x288xbf16, #tpu.memory_space<vmem>>, vector<1x8x288xbf16>,
    %c0_51 = arith.constant 0 : index
    %c0_52 = arith.constant 0 : index
    %59 = vector.load %arg3[%c0_51, %c0_52] : memref<1x288xf32, #tpu.memory_space<vmem>>, vector<1x288xf32>
    %60 = vector.broadcast %59 : vector<1x288xf32> to vector<8x288xf32>
    %61 = arith.mulf %54, %60 : vector<8x288xf32>
    %cst_53 = arith.constant dense<0.000000e+00> : vector<8xf32>
    %62 = vector.multi_reduction <add>, %61, %cst_53 [1] : vector<8x288xf32> to vector<8xf32>
    %63 = vector.shape_cast %62 : vector<8xf32> to vector<8x1xf32>
    %cst_54 = arith.constant 3.906250e-03 : f32
    %64 = vector.broadcast %cst_54 : f32 to vector<8x1xf32>
    %65 = arith.mulf %63, %64 : vector<8x1xf32>
    %66 = vector.broadcast %65 : vector<8x1xf32> to vector<8x288xf32>
    %67 = arith.subf %54, %66 : vector<8x288xf32>
    %68 = vector.broadcast %59 : vector<1x288xf32> to vector<8x288xf32>
    %69 = arith.mulf %67, %68 : vector<8x288xf32>
    %c0_55 = arith.constant 0 : index
    %c0_56 = arith.constant 0 : index
    %c0_57 = arith.constant 0 : index
    %70 = vector.load %arg5[%c0_55, %c0_56, %c0_57] : memref<1x8x1xf32, #tpu.memory_space<vmem>>, vector<1x8x1xf32>
    %71 = vector.shape_cast %70 : vector<1x8x1xf32> to vector<8x1xf32>
    %72 = vector.shape_cast %65 : vector<8x1xf32> to vector<1x8x1xf32>
    tpu.vector_store %arg5[%c0_55, %c0_56, %c0_57], %72 {strides = array<i32>} : memref<1x8x1xf32, #tpu.memory_space<vmem>>, vector<1x8x1xf32>,
    %73 = arith.mulf %69, %69 : vector<8x288xf32>
    %cst_58 = arith.constant dense<0.000000e+00> : vector<8xf32>
    %74 = vector.multi_reduction <add>, %73, %cst_58 [1] : vector<8x288xf32> to vector<8xf32>
    %75 = vector.shape_cast %74 : vector<8xf32> to vector<8x1xf32>
    %c0_59 = arith.constant 0 : index
    %c0_60 = arith.constant 0 : index
    %c0_61 = arith.constant 0 : index
    %76 = vector.load %arg6[%c0_59, %c0_60, %c0_61] : memref<1x8x1xf32, #tpu.memory_space<vmem>>, vector<1x8x1xf32>
    %77 = vector.shape_cast %76 : vector<1x8x1xf32> to vector<8x1xf32>
    %78 = vector.shape_cast %75 : vector<8x1xf32> to vector<1x8x1xf32>
    tpu.vector_store %arg6[%c0_59, %c0_60, %c0_61], %78 {strides = array<i32>} : memref<1x8x1xf32, #tpu.memory_space<vmem>>, vector<1x8x1xf32>,
    return
  }
  func.func @transform_0(%arg0: i32) -> (i32, i32, i32) {
    %c0_i32 = arith.constant 0 : i32
    %c0_i32_0 = arith.constant 0 : i32
    %c0_i32_1 = arith.constant 0 : i32
    return %arg0, %c0_i32, %c0_i32_0 : i32, i32, i32
  }
  func.func @transform_1(%arg0: i32) -> (i32, i32, i32) {
    %c0_i32 = arith.constant 0 : i32
    %c0_i32_0 = arith.constant 0 : i32
    %c0_i32_1 = arith.constant 0 : i32
    %c0_i32_2 = arith.constant 0 : i32
    return %c0_i32, %c0_i32_0, %c0_i32_1 : i32, i32, i32
  }
  func.func @transform_2(%arg0: i32) -> (i32, i32) {
    %c0_i32 = arith.constant 0 : i32
    %c0_i32_0 = arith.constant 0 : i32
    %c0_i32_1 = arith.constant 0 : i32
    return %c0_i32, %c0_i32_0 : i32, i32
  }
  func.func @transform_3(%arg0: i32) -> (i32, i32, i32) {
    %c0_i32 = arith.constant 0 : i32
    %c0_i32_0 = arith.constant 0 : i32
    %c0_i32_1 = arith.constant 0 : i32
    return %arg0, %c0_i32, %c0_i32_0 : i32, i32, i32
  }
  func.func @transform_4(%arg0: i32) -> (i32, i32, i32) {
    %c0_i32 = arith.constant 0 : i32
    %c0_i32_0 = arith.constant 0 : i32
    %c0_i32_1 = arith.constant 0 : i32
    return %arg0, %c0_i32, %c0_i32_0 : i32, i32, i32
  }
  func.func @transform_5(%arg0: i32) -> (i32, i32, i32) {
    %c0_i32 = arith.constant 0 : i32
    %c0_i32_0 = arith.constant 0 : i32
    %c0_i32_1 = arith.constant 0 : i32
    return %arg0, %c0_i32, %c0_i32_0 : i32, i32, i32
  }
}

</mosaic_0001>

<bundles_post_ra>
// kernel: _relu_ccl_conv_bn.1
= control target key start
LH: loop header
LB: loop body
LE: loop exit
PB: predicated region body
PF: predicated region fallthrough
CT: control target
= control target key end

     0   :  { %s1783_s18 = smov 0   ;;  %s1974_s0 = inlined_call_operand.vmem [shape: bf16[2,4,326], index: 0, kind: input, shape index: {}]   ;;  %s1975_s1 = inlined_call_operand.vmem [shape: bf16[9,8,4], index: 1, kind: input, shape index: {}]   ;;  %s1976_s2 = inlined_call_operand.vmem [shape: f32[1,288], index: 2, kind: input, shape index: {}]   ;;  %s1977_s3 = inlined_call_operand.vmem [shape: bf16[2,8,288], index: 3, kind: output, shape index: {0}]   ;;  %s1978_s4 = inlined_call_operand.vmem [shape: f32[2,8,1], index: 4, kind: output, shape index: {1}]   ;;  %s1979_s5 = inlined_call_operand.vmem [shape: f32[2,8,1], index: 5, kind: output, shape index: {2}]  }
   0x1 LB: > { %s1517_s19 = sadd.s32 4294967295, %s1739_s18   ;;  %p1521_p0 = scmp.ge.s32.totalorder %s1739_s18, 1  ;;  %s1739_s18 = sphi %s1783_s18, %s16_s18  }
   0x2   : > { %p192_p1 = scmp.lt.s32.totalorder %s1739_s18, 3 }
   0x4   : > { %p193_p2 = pnand %p1521_p0, %p192_p1 }
   0x5   : > { %p228_p3 = scmp.lt.s32.totalorder (!%p193_p2), %s1517_s19, 1  ;;  %v256_v0 = vlaneseq (!%p193_p2)  ;;  %v1741_v1 = vmov (!%p193_p2), 1983009808   ;;  %v1742_v3 = vmov (!%p193_p2), 0.0   ;;  %vm1743_vm0 = vmmov (!%p193_p2), 0   ;;  %s1745_s24 = smov (!%p193_p2), 127  }
   0x6   : > { %196 = sbr.rel (%p193_p2) target bundleno = 756 (0x2f4), region = 32  ;;  %v254_v2 = vunpack.c.l.s4 (!%p193_p2), %v1741_v1  ;;  %1585 = vmatprep.subr.bf16.mxu1 (!%p193_p2), %v1742_v3  ;;  %1587 = vmatprep.mubr.msk.bf16.mxu1 (!%p193_p2), %vm1743_vm0, %v1742_v3  ;;  %v1744_v6 = vmov (!%p193_p2), 0   ;;  %s1746_s25 = smov (!%p193_p2), 126   ;;  %vm281_vm1 = vcmask (!%p193_p2), 1041408   ;;  %vm274_vm2 = vcmask (!%p193_p2), 1039360  }
   0x7   : > { %v1794_v4 = vshrl.u32 (!%p193_p2), %v256_v0, 7  ;;  %323 = vmatprep.mubr.bf16.mxu0 (!%p193_p2), %v1744_v6  ;;  %s1747_s26 = smov (!%p193_p2), 110   ;;  %s1748_s27 = smov (!%p193_p2), 109   ;;  %v1526_v52 = vld [vmem:[%s1975_s1 + $0x4] sm:$0xf] (!%p193_p2)  ;;  %vm277_vm3 = vcmask (!%p193_p2), 31744  }
   0x8   : > { %v255_v5 = vunpack.c.0.s8 (!%p193_p2), %v254_v2  ;;  %s1749_s28 = smov (!%p193_p2), 108   ;;  %s1750_s29 = smov (!%p193_p2), 92   ;;  %vm491_vm4 = vcmask (!%p193_p2), 1031168   ;;  %v247_v63 = vld [vmem:[%s1975_s1] sm:$0xf] (!%p193_p2)  ;;  %vm616_vm5 = vcmask (!%p193_p2), 900096  }
   0x9   : > { %s1751_s30 = smov (!%p193_p2), 91   ;;  %s1752_s6 = smov (!%p193_p2), 90   ;;  %vm741_vm6 = vcmask (!%p193_p2), 891904   ;;  %vm866_vm7 = vcmask (!%p193_p2), 883712   ;;  %vm991_vm8 = vcmask (!%p193_p2), 752640   ;;  %vm1116_vm9 = vcmask (!%p193_p2), 744448  }
   0xa   : > { %v1801_v7 = vsub.s32 (!%p193_p2), %v255_v5, %v1794_v4  ;;  %vm1241_vm10 = vcmask (!%p193_p2), 736256   ;;  %vm1354_vm11 = vcmask (!%p193_p2), 257024   ;;  %vm1377_vm12 = vcmask (!%p193_p2), 261120  }
   0xb   : > { %vm1389_vm13 = vcmask (!%p193_p2), 7168  }
   0xd   : > { %s1981_s19 = smov (!%p228_p3, %s1517_s19), 1 }
   0xe   : > { %s1703_s20 = smul.u32 6, %s1981_s19  ;;  %s1524_s8 = sshll.u32 %s1981_s19, 3 }
   0xf   : > { %s241_s11 = scalar_lea.vmem %s1978_s4, %s1524_s8  ;;  %s245_s13 = scalar_lea.vmem %s1979_s5, %s1524_s8 }
  0x10   : > { %s1806_s23 = scalar_lea.vmem %s1974_s0, %s1703_s20 }
  0x11   : > { %v248_v8 = vld [vmem:[%s1806_s23] sm:$0x3f] }
  0x12   : > { %v1810_v9 = vrot.slane %v248_v8, %v1801_v7  ;;  %v252_v10 = vcombine.high %v248_v8, %v248_v8  ;;  %v467_v11 = vld [vmem:[%s1806_s23] sm:$0x3f] }
  0x13   : > { %v476_v14 = vrot.slane %v467_v11, %v1801_v7  ;;  %v469_v15 = vcombine.high %v467_v11, %v467_v11  ;;  %v592_v17 = vld [vmem:[%s1806_s23] sm:$0x3f] }
  0x14   : > { %268 = vrot.lane.b32.xlu0 %v1810_v9, %s1745_s24  ;;  %v1815_v12 = vrot.slane %v252_v10, %v1801_v7  ;;  %v1819_v13 = vcombine.high %v1810_v9, %v1810_v9  ;;  %v601_v19 = vrot.slane %v592_v17, %v1801_v7  ;;  %v594_v20 = vcombine.high %v592_v17, %v592_v17  ;;  %v717_v22 = vld [vmem:[%s1806_s23] sm:$0x3f]  ;;  %v1533_v10 = vld [vmem:[%s1975_s1 + $0x8] sm:$0xf] }
  0x15   : > { %v484_v16 = vcombine.high %v476_v14, %v476_v14  ;;  %v483_v18 = vrot.slane %v469_v15, %v1801_v7  ;;  %v726_v24 = vrot.slane %v717_v22, %v1801_v7  ;;  %v719_v25 = vcombine.high %v717_v22, %v717_v22  ;;  %v842_v27 = vld [vmem:[%s1806_s23] sm:$0x3f] }
  0x16   : > { %272 = vrot.lane.b32.xlu1 %v1815_v12, %s1745_s24  ;;  %v609_v21 = vcombine.high %v601_v19, %v601_v19  ;;  %v608_v23 = vrot.slane %v594_v20, %v1801_v7  ;;  %v851_v29 = vrot.slane %v842_v27, %v1801_v7  ;;  %v844_v30 = vcombine.high %v842_v27, %v842_v27  ;;  %v967_v32 = vld [vmem:[%s1806_s23] sm:$0x3f] }
  0x17   : > { %v734_v26 = vcombine.high %v726_v24, %v726_v24  ;;  %v733_v28 = vrot.slane %v719_v25, %v1801_v7  ;;  %v976_v34 = vrot.slane %v967_v32, %v1801_v7  ;;  %v969_v35 = vcombine.high %v967_v32, %v967_v32  ;;  %v1092_v37 = vld [vmem:[%s1806_s23] sm:$0x3f] }
  0x18   : > { %270 = vrot.lane.b32.xlu0 %v1819_v13, %s1745_s24  ;;  %v859_v31 = vcombine.high %v851_v29, %v851_v29  ;;  %v858_v33 = vrot.slane %v844_v30, %v1801_v7  ;;  %v1101_v39 = vrot.slane %v1092_v37, %v1801_v7  ;;  %v1094_v40 = vcombine.high %v1092_v37, %v1092_v37  ;;  %v1217_v42 = vld [vmem:[%s1806_s23] sm:$0x3f] }
  0x19   : > { %v984_v36 = vcombine.high %v976_v34, %v976_v34  ;;  %v983_v38 = vrot.slane %v969_v35, %v1801_v7  ;;  %v1226_v44 = vrot.slane %v1217_v42, %v1801_v7  ;;  %v1219_v45 = vcombine.high %v1217_v42, %v1217_v42  ;;  %v1549_v42 = vld [vmem:[%s1975_s1 + $0x18] sm:$0xf] }
  0x1a   : > { %485 = vrot.lane.b32.xlu1 %v476_v14, %s1746_s25  ;;  %v1109_v41 = vcombine.high %v1101_v39, %v1101_v39  ;;  %v1108_v43 = vrot.slane %v1094_v40, %v1801_v7  ;;  %v382_v55 = vsel %vm281_vm1, %v1815_v12, 0  ;;  %v376_v58 = vsel %vm281_vm1, %v1810_v9, 0 }
  0x1b   : > { %v1234_v46 = vcombine.high %v1226_v44, %v1226_v44  ;;  %v1233_v47 = vrot.slane %v1219_v45, %v1801_v7 }
  0x1c   : > { %487 = vrot.lane.b32.xlu0 %v484_v16, %s1746_s25 }
  0x1e   : > { %489 = vrot.lane.b32.xlu1 %v483_v18, %s1746_s25  ;;  %v1537_v18 = vld [vmem:[%s1975_s1 + $0xc] sm:$0xf] }
  0x20   : > { %610 = vrot.lane.b32.xlu0 %v601_v19, %s1747_s26 }
  0x22   : > { %612 = vrot.lane.b32.xlu1 %v609_v21, %s1747_s26 }
  0x24   : > { %614 = vrot.lane.b32.xlu0 %v608_v23, %s1747_s26 }
  0x26   : > { %735 = vrot.lane.b32.xlu1 %v726_v24, %s1748_s27 }
  0x28   : > { %737 = vrot.lane.b32.xlu0 %v734_v26, %s1748_s27  ;;  %v1541_v26 = vld [vmem:[%s1975_s1 + $0x10] sm:$0xf] }
  0x2a   : > { %739 = vrot.lane.b32.xlu1 %v733_v28, %s1748_s27  ;;  %s1704_s27 = smul.u32 12, %s1981_s19 }
  0x2c   : > { %860 = vrot.lane.b32.xlu0 %v851_v29, %s1749_s28  ;;  %s237_s7 = scalar_lea.vmem %s1977_s3, %s1704_s27 }
  0x2e   : > { %862 = vrot.lane.b32.xlu1 %v859_v31, %s1749_s28 }
  0x30   : > { %864 = vrot.lane.b32.xlu0 %v858_v33, %s1749_s28 }
  0x32   : > { %985 = vrot.lane.b32.xlu1 %v976_v34, %s1750_s29  ;;  %v1545_v34 = vld [vmem:[%s1975_s1 + $0x14] sm:$0xf] }
  0x34   : > { %987 = vrot.lane.b32.xlu0 %v984_v36, %s1750_s29 }
  0x36   : > { %989 = vrot.lane.b32.xlu1 %v983_v38, %s1750_s29 }
  0x38   : > { %1110 = vrot.lane.b32.xlu0 %v1101_v39, %s1751_s30 }
  0x3a   : > { %1112 = vrot.lane.b32.xlu1 %v1109_v41, %s1751_s30 }
  0x3c   : > { %1114 = vrot.lane.b32.xlu0 %v1108_v43, %s1751_s30 }
  0x3e   : > { %1235 = vrot.lane.b32.xlu1 %v1226_v44, %s1752_s6 }
  0x40   : > { %1237 = vrot.lane.b32.xlu0 %v1234_v46, %s1752_s6 }
  0x42   : > { %1239 = vrot.lane.b32.xlu1 %v1233_v47, %s1752_s6 }
  0x86   : > { %v269_v48 = vpop.permute.xlu0 %268 }
  0x88   : > { %v273_v49 = vpop.permute.xlu1 %272 }
  0x89   : > { %v289_v50 = vsel %vm281_vm1, %v273_v49, 0 }
  0x8a   : > { %v271_v51 = vpop.permute.xlu0 %270  ;;  %1586 = vmatpush3.bf16.msra.mxu1 %v289_v50 }
  0x8b   : > { %v276_v53 = vsel %vm274_vm2, %v271_v51, %v273_v49  ;;  %v275_v54 = vsel %vm274_vm2, %v269_v48, %v271_v51  ;;  %1591 = vmatprep.subr.bf16.mxu1 %v1742_v3  ;;  %v1553_v49 = vld [vmem:[%s1975_s1 + $0x1c] sm:$0xf] }
  0x8c   : > { %1527 = vmatprep.subr.msk.bf16.mxu0 %vm281_vm1, %v276_v53  ;;  %v283_v56 = vsel %vm281_vm1, %v275_v54, 0  ;;  %v486_v57 = vpop.permute.xlu1 %485  ;;  %v1557_v53 = vld [vmem:[%s1975_s1 + $0x20] sm:$0xf]  ;;  %v1368_v54 = vsub.s32 2, %v1794_v4 }
  0x8d   : > { %292 = vmatpush1.bf16.msra.mxu0 %v283_v56  ;;  %1588 = vmatmul.mubr.msk.bf16.vlgmr.msra.gmra.mrb[0].mxu1 %vm277_vm3, %v1526_v52  ;;  %v1364_v56 = vsub.s32 1, %v1794_v4 }
  0x8e   : > { %1530 = vmatprep.subr.msk.bf16.mxu0 %vm281_vm1, %v1819_v13  ;;  %1592 = vmatpush3.bf16.msra.mxu1 %v382_v55  ;;  %v488_v59 = vpop.permute.xlu0 %487  ;;  %v1360_v55 = vsub.s32 0, %v1794_v4 }
  0x8f   : > { %1593 = vmatprep.mubr.msk.bf16.mxu1 %vm1743_vm0, %v1742_v3  ;;  %1597 = vmatprep.subr.bf16.mxu1 %v1742_v3  ;;  %v492_v0 = vsel %vm491_vm4, %v486_v57, %v488_v59 }
  0x90   : > { %1528 = vmatmul.mubr.msk.bf16.vlgmr.msra.gmra.mrb[0].mxu0 %vm277_vm3, %v1526_v52  ;;  %v490_v60 = vpop.permute.xlu1 %489  ;;  %v498_v7 = vsel %vm281_vm1, %v492_v0, 0 }
  0x91   : > { %385 = vmatpush1.bf16.msra.mxu0 %v376_v58  ;;  %v493_v61 = vsel %vm491_vm4, %v488_v59, %v490_v60  ;;  %416 = vmatprep.mubr.bf16.mxu0 %v1744_v6  ;;  %v504_v1 = vsel %vm281_vm1, %v490_v60, 0 }
  0x92   : > { %1534 = vmatprep.subr.msk.bf16.mxu0 %vm281_vm1, %v493_v61  ;;  %v611_v62 = vpop.permute.xlu0 %610 }
  0x94   : > { %v613_v2 = vpop.permute.xlu1 %612 }
  0x95   : > { %v617_v11 = vsel %vm616_vm5, %v611_v62, %v613_v2 }
  0x96   : > { %v615_v5 = vpop.permute.xlu0 %614  ;;  %v623_v15 = vsel %vm281_vm1, %v617_v11, 0 }
  0x97   : > { %v618_v8 = vsel %vm616_vm5, %v613_v2, %v615_v5  ;;  %v629_v12 = vsel %vm281_vm1, %v615_v5, 0 }
  0x98   : > { %v736_v9 = vpop.permute.xlu1 %735 }
  0x99   : > { %1594 = vmatmul.mubr.msk.bf16.vlgmr.msra.gmra.mrb[0].mxu1 %vm277_vm3, %v247_v63 }
  0x9a   : > { %1598 = vmatpush3.bf16.msra.mxu1 %v504_v1  ;;  %1599 = vmatprep.mubr.msk.bf16.mxu1 %vm1743_vm0, %v1742_v3  ;;  %v738_v13 = vpop.permute.xlu0 %737 }
  0x9b   : > { %1603 = vmatprep.subr.bf16.mxu1 %v1742_v3  ;;  %v742_v19 = vsel %vm741_vm6, %v736_v9, %v738_v13 }
  0x9c   : > { %1531 = vmatmul.mubr.msk.bf16.vlgmr.msra.gmra.mrb[0].mxu0 %vm277_vm3, %v247_v63  ;;  %v740_v14 = vpop.permute.xlu1 %739  ;;  %v748_v23 = vsel %vm281_vm1, %v742_v19, 0 }
  0x9d   : > { %507 = vmatpush1.bf16.msra.mxu0 %v498_v7  ;;  %538 = vmatprep.mubr.bf16.mxu0 %v1744_v6  ;;  %v743_v16 = vsel %vm741_vm6, %v738_v13, %v740_v14  ;;  %v754_v20 = vsel %vm281_vm1, %v740_v14, 0 }
  0x9e   : > { %1538 = vmatprep.subr.msk.bf16.mxu0 %vm281_vm1, %v618_v8  ;;  %v861_v17 = vpop.permute.xlu0 %860 }
  0xa0   : > { %v863_v21 = vpop.permute.xlu1 %862 }
  0xa1   : > { %v867_v27 = vsel %vm866_vm7, %v861_v17, %v863_v21 }
  0xa2   : > { %v865_v22 = vpop.permute.xlu0 %864  ;;  %v873_v31 = vsel %vm281_vm1, %v867_v27, 0 }
  0xa3   : > { %v868_v24 = vsel %vm866_vm7, %v863_v21, %v865_v22  ;;  %v879_v28 = vsel %vm281_vm1, %v865_v22, 0 }
  0xa4   : > { %v986_v25 = vpop.permute.xlu1 %985 }
  0xa5   : > { %1600 = vmatmul.mubr.msk.bf16.vlgmr.msra.gmra.mrb[0].mxu1 %vm277_vm3, %v1533_v10 }
  0xa6   : > { %1604 = vmatpush3.bf16.msra.mxu1 %v629_v12  ;;  %1605 = vmatprep.mubr.msk.bf16.mxu1 %vm1743_vm0, %v1742_v3  ;;  %v988_v29 = vpop.permute.xlu0 %987 }
  0xa7   : > { %1609 = vmatprep.subr.bf16.mxu1 %v1742_v3  ;;  %v992_v35 = vsel %vm991_vm8, %v986_v25, %v988_v29 }
  0xa8   : > { %1535 = vmatmul.mubr.msk.bf16.vlgmr.msra.gmra.mrb[0].mxu0 %vm277_vm3, %v1533_v10  ;;  %v990_v30 = vpop.permute.xlu1 %989  ;;  %v998_v39 = vsel %vm281_vm1, %v992_v35, 0 }
  0xa9   : > { %632 = vmatpush1.bf16.msra.mxu0 %v623_v15  ;;  %663 = vmatprep.mubr.bf16.mxu0 %v1744_v6  ;;  %v993_v32 = vsel %vm991_vm8, %v988_v29, %v990_v30  ;;  %v1004_v36 = vsel %vm281_vm1, %v990_v30, 0 }
  0xaa   : > { %1542 = vmatprep.subr.msk.bf16.mxu0 %vm281_vm1, %v743_v16  ;;  %v1111_v33 = vpop.permute.xlu0 %1110 }
  0xac   : > { %v1113_v37 = vpop.permute.xlu1 %1112 }
  0xad   : > { %v1117_v43 = vsel %vm1116_vm9, %v1111_v33, %v1113_v37 }
  0xae   : > { %v1115_v38 = vpop.permute.xlu0 %1114  ;;  %v1123_v47 = vsel %vm281_vm1, %v1117_v43, 0 }
  0xaf   : > { %v1118_v40 = vsel %vm1116_vm9, %v1113_v37, %v1115_v38  ;;  %v1129_v44 = vsel %vm281_vm1, %v1115_v38, 0 }
  0xb0   : > { %v1236_v41 = vpop.permute.xlu1 %1235 }
  0xb1   : > { %1606 = vmatmul.mubr.msk.bf16.vlgmr.msra.gmra.mrb[0].mxu1 %vm277_vm3, %v1537_v18 }
  0xb2   : > { %1610 = vmatpush3.bf16.msra.mxu1 %v754_v20  ;;  %1611 = vmatprep.mubr.msk.bf16.mxu1 %vm1743_vm0, %v1742_v3  ;;  %v1238_v45 = vpop.permute.xlu0 %1237 }
  0xb3   : > { %1615 = vmatprep.subr.bf16.mxu1 %v1742_v3  ;;  %v1242_v50 = vsel %vm1241_vm10, %v1236_v41, %v1238_v45 }
  0xb4   : > { %1539 = vmatmul.mubr.msk.bf16.vlgmr.msra.gmra.mrb[0].mxu0 %vm277_vm3, %v1537_v18  ;;  %v1240_v46 = vpop.permute.xlu1 %1239  ;;  %v1248_v52 = vsel %vm281_vm1, %v1242_v50, 0 }
  0xb5   : > { %757 = vmatpush1.bf16.msra.mxu0 %v748_v23  ;;  %788 = vmatprep.mubr.bf16.mxu0 %v1744_v6  ;;  %v1243_v48 = vsel %vm1241_vm10, %v1238_v45, %v1240_v46  ;;  %v1254_v51 = vsel %vm281_vm1, %v1240_v46, 0 }
  0xb6   : > { %1546 = vmatprep.subr.msk.bf16.mxu0 %vm281_vm1, %v868_v24 }
  0xbd   : > { %1612 = vmatmul.mubr.msk.bf16.vlgmr.msra.gmra.mrb[0].mxu1 %vm277_vm3, %v1541_v26 }
  0xbe   : > { %1616 = vmatpush3.bf16.msra.mxu1 %v879_v28  ;;  %1617 = vmatprep.mubr.msk.bf16.mxu1 %vm1743_vm0, %v1742_v3 }
  0xbf   : > { %1621 = vmatprep.subr.bf16.mxu1 %v1742_v3 }
  0xc0   : > { %1543 = vmatmul.mubr.msk.bf16.vlgmr.msra.gmra.mrb[0].mxu0 %vm277_vm3, %v1541_v26 }
  0xc1   : > { %882 = vmatpush1.bf16.msra.mxu0 %v873_v31  ;;  %913 = vmatprep.mubr.bf16.mxu0 %v1744_v6 }
  0xc2   : > { %1550 = vmatprep.subr.msk.bf16.mxu0 %vm281_vm1, %v993_v32 }
  0xc9   : > { %1618 = vmatmul.mubr.msk.bf16.vlgmr.msra.gmra.mrb[0].mxu1 %vm277_vm3, %v1545_v34 }
  0xca   : > { %1622 = vmatpush3.bf16.msra.mxu1 %v1004_v36  ;;  %1623 = vmatprep.mubr.msk.bf16.mxu1 %vm1743_vm0, %v1742_v3 }
  0xcb   : > { %1627 = vmatprep.subr.bf16.mxu1 %v1742_v3 }
  0xcc   : > { %1547 = vmatmul.mubr.msk.bf16.vlgmr.msra.gmra.mrb[0].mxu0 %vm277_vm3, %v1545_v34 }
  0xcd   : > { %1007 = vmatpush1.bf16.msra.mxu0 %v998_v39  ;;  %1038 = vmatprep.mubr.bf16.mxu0 %v1744_v6 }
  0xce   : > { %1554 = vmatprep.subr.msk.bf16.mxu0 %vm281_vm1, %v1118_v40 }
  0xd5   : > { %1624 = vmatmul.mubr.msk.bf16.vlgmr.msra.gmra.mrb[0].mxu1 %vm277_vm3, %v1549_v42 }
  0xd6   : > { %1628 = vmatpush3.bf16.msra.mxu1 %v1129_v44  ;;  %1629 = vmatprep.mubr.msk.bf16.mxu1 %vm1743_vm0, %v1742_v3 }
  0xd7   : > { %1633 = vmatprep.subr.bf16.mxu1 %v1742_v3 }
  0xd8   : > { %1551 = vmatmul.mubr.msk.bf16.vlgmr.msra.gmra.mrb[0].mxu0 %vm277_vm3, %v1549_v42 }
  0xd9   : > { %1132 = vmatpush1.bf16.msra.mxu0 %v1123_v47  ;;  %1163 = vmatprep.mubr.bf16.mxu0 %v1744_v6 }
  0xda   : > { %1558 = vmatprep.subr.msk.bf16.mxu0 %vm281_vm1, %v1243_v48 }
  0xe1   : > { %1630 = vmatmul.mubr.msk.bf16.vlgmr.msra.gmra.mrb[0].mxu1 %vm277_vm3, %v1553_v49 }
  0xe2   : > { %1634 = vmatpush3.bf16.msra.mxu1 %v1254_v51  ;;  %1635 = vmatprep.mubr.msk.bf16.mxu1 %vm1743_vm0, %v1742_v3  ;;  %v1356_v3 = vld [vmem:[%s1976_s2] sm:$0x7] }
  0xe3   : > { %v1369_v57 = vrot.slane %v1356_v3, %v1368_v54  ;;  %v1361_v58 = vrot.slane %v1356_v3, %v1360_v55  ;;  %v1365_v61 = vrot.slane %v1356_v3, %v1364_v56 }
  0xe4   : > { %1555 = vmatmul.mubr.msk.bf16.vlgmr.msra.gmra.mrb[0].mxu0 %vm277_vm3, %v1553_v49 }
  0xe5   : > { %1257 = vmatpush1.bf16.msra.mxu0 %v1248_v52  ;;  %1288 = vmatprep.mubr.bf16.mxu0 %v1744_v6 }
  0xed   : > { %1636 = vmatmul.mubr.msk.bf16.vlgmr.msra.gmra.mrb[0].mxu1 %vm277_vm3, %v1557_v53 }
  0xf0   : > { %1559 = vmatmul.mubr.msk.bf16.vlgmr.msra.gmra.mrb[0].mxu0 %vm277_vm3, %v1557_v53 }
 0x1c0   : > { %v1331_v6 = vpop.f32.mrb[0].mxu1 }
 0x1c1   : > { %v1566_v59 = vpack.c.bf16 %v1331_v6, %v1331_v6  ;;  %v1637_v60 = vpop.f32.mrb[1].mxu1  ;;  %v1375_v1 = vmul.f32 %v1369_v57, %v1331_v6 }
 0x1c2   : > { %v1334_v62 = vpop.f32.mrb[2].mxu1 }
 0x1c3   : > { %v1290_v63 = vpop.f32.mrb[0].mxu0  ;;  %v1638_v0 = vpop.f32.mrb[3].mxu1  ;;  %1355 = vst.msk [vmem:[%s237_s7 + $0x8] sm:$0xf] %vm1354_vm11, %v1566_v59  ;;  %v1378_v11 = vsel %vm1377_vm12, %v1375_v1, 0.0 }
 0x1c4   : > { %v1373_v2 = vmul.f32 %v1361_v58, %v1290_v63  ;;  %v1292_v5 = vpop.f32.mrb[1].mxu0 }
 0x1c5   : > { %v1565_v4 = vpack.c.bf16 %v1292_v5, %v1290_v63  ;;  %v1374_v7 = vmul.f32 %v1365_v61, %v1292_v5  ;;  %v1294_v8 = vpop.f32.mrb[2].mxu0 }
 0x1c6   : > { %v1295_v9 = vpop.f32.mrb[3].mxu0 }
 0x1c7   : > { %1353 = vst [vmem:[%s237_s7] sm:$0xff] %v1565_v4  ;;  %v1376_v10 = vadd.f32 %v1374_v7, %v1373_v2 }
 0x1c9   : > { %v1379_v12 = vadd.f32 %v1378_v11, %v1376_v10 }
 0x1cb   : > { %1380 = vadd.xlane.f32.xlu0 %v1379_v12 }
 0x258   : > { %v1381_v13 = vpop.xlane.xlu0 %1380 }
 0x259   : > { %v1382_v14 = vmul.f32 0.00390625, %v1381_v13 }
 0x25b   : > { %v1383_v15 = vsub.f32 %v1290_v63, %v1382_v14  ;;  %v1384_v16 = vsub.f32 %v1292_v5, %v1382_v14  ;;  %v1385_v17 = vsub.f32 %v1331_v6, %v1382_v14  ;;  %1390 = vst.msk [vmem:[%s241_s11] sm:$0xff] %vm1389_vm13, %v1382_v14 }
 0x25d   : > { %v1386_v18 = vmul.f32 %v1383_v15, %v1361_v58  ;;  %v1387_v19 = vmul.f32 %v1384_v16, %v1365_v61  ;;  %v1388_v20 = vmul.f32 %v1385_v17, %v1369_v57 }
 0x25f   : > { %v1391_v21 = vmul.f32 %v1386_v18, %v1386_v18  ;;  %v1392_v22 = vmul.f32 %v1387_v19, %v1387_v19  ;;  %v1393_v23 = vmul.f32 %v1388_v20, %v1388_v20 }
 0x261   : > { %v1394_v24 = vadd.f32 %v1392_v22, %v1391_v21  ;;  %v1395_v25 = vsel %vm1377_vm12, %v1393_v23, 0.0 }
 0x263   : > { %v1396_v26 = vadd.f32 %v1395_v25, %v1394_v24 }
 0x265   : > { %1397 = vadd.xlane.f32.xlu1 %v1396_v26 }
 0x2f2   : > { %v1398_v27 = vpop.xlane.xlu1 %1397 }
 0x2f3   : > { %1399 = vst.msk [vmem:[%s245_s13] sm:$0xff] %vm1389_vm13, %v1398_v27 }
 0x2f4 PF: > { %s16_s18 = sadd.s32 1, %s1739_s18  }
 0x2f5   : > { %p13_p4 = scmp.ge.s32.totalorder %s16_s18, 4  }
 0x2f7   :  { %15 = sbr.rel (!%p13_p4) target bundleno = 1 (0x1), region = 94 }

</bundles_post_ra>
